<compile_context>
chip_gen: v6e
topology: v6e:2x2x1
jax: 0.10.0
libtpu: 0.0.40
codegen_flags: <defaults>
</compile_context>

<pallas_src>
import functools

import jax
import jax.numpy as jnp
from jax.experimental import pallas as pl
from jax.experimental.pallas import tpu as pltpu


def _gumbel_softmax_kernel(temp_ref, logits_ref, noise_ref, y_ref, id_ref, *, hard):
    # Gumbel(0,1) noise from uniform(0,1): -log(-log(u + eps) + eps)
    eps = 1e-20
    u = noise_ref[...]
    g = -jnp.log(-jnp.log(u + eps) + eps)

    z = logits_ref[...].astype(jnp.float32) + g

    # Argmax along the last dim computed on z (softmax is monotonic for T > 0,
    # so argmax(z) == argmax(softmax(z / T))).  First maximal index, matching
    # torch.max tie-breaking.
    n = z.shape[-1]
    iota = jax.lax.broadcasted_iota(jnp.int32, z.shape, dimension=1)
    z_max = jnp.max(z, axis=-1, keepdims=True)
    idx = jnp.min(jnp.where(z == z_max, iota, n), axis=-1, keepdims=True)
    id_ref[...] = idx.astype(id_ref.dtype)

    if hard:
        # One-hot output; skip exp/sum/divide entirely (temperature is
        # irrelevant to the argmax).
        # TODO(synk): no straight-through estimator (y_hard - stop_grad(y) + y);
        # forward matches the PyTorch module, gradients of the hard path do not.
        y_ref[...] = jnp.where(iota == idx, 1.0, 0.0).astype(y_ref.dtype)
    else:
        inv_t = 1.0 / temp_ref[0]                      # one scalar divide per tile
        zs = (z - z_max) * inv_t                       # stabilized logits / temperature
        ez = jnp.exp(zs)
        denom = jnp.sum(ez, axis=-1, keepdims=True)
        y_ref[...] = (ez * (1.0 / denom)).astype(y_ref.dtype)   # per-row reciprocal


def gumbel_connector(logits, temperature, key, hard=False, return_max_id=False,
                     *, block_rows=128):
    """Pallas equivalent of GumbelConnector.forward.

    logits:      [batch, n_class] array (any float dtype; kept native in HBM)
    temperature: non-negative scalar
    key:         jax.random key used to draw the uniform noise
    """
    b, n = logits.shape

    # Uniform(0,1) noise; the Gumbel transform runs inside the kernel.
    u = jax.random.uniform(key, (b, n), dtype=jnp.float32)
    temp_arr = jnp.asarray([temperature], dtype=jnp.float32)

    # Row tile: full batch for small inputs, otherwise a multiple-of-8 tile
    # sized to a few MiB per buffer (VMEM-safe on v7x's 64 MiB, pipelined).
    tb = b if b <= block_rows else block_rows
    grid = (pl.cdiv(b, tb),)

    kernel = functools.partial(_gumbel_softmax_kernel, hard=hard)

    y, y_hard = pl.pallas_call(
        kernel,
        grid=grid,
        out_shape=(
            jax.ShapeDtypeStruct((b, n), logits.dtype),
            jax.ShapeDtypeStruct((b, 1), jnp.int32),
        ),
        in_specs=[
            pl.BlockSpec(memory_space=pltpu.SMEM),        # temperature (scalar)
            pl.BlockSpec((tb, n), lambda i: (i, 0)),      # logits row tile
            pl.BlockSpec((tb, n), lambda i: (i, 0)),      # uniform noise row tile
        ],
        out_specs=(
            pl.BlockSpec((tb, n), lambda i: (i, 0)),      # y row tile
            pl.BlockSpec((tb, 1), lambda i: (i, 0)),      # argmax id row tile
        ),
        compiler_params=pltpu.CompilerParams(
            dimension_semantics=("parallel",)),
    )(temp_arr, logits, u)

    if return_max_id:
        return y, y_hard
    return y


if __name__ == "__main__":
    # GumbelConnector has no learnable parameters; nothing to initialize.
    batch, n_class = 8, 128
    key = jax.random.PRNGKey(0)
    logit_key, noise_key = jax.random.split(key)
    logits = jax.random.normal(logit_key, (batch, n_class), dtype=jnp.float32)

    temperature = 0.8

    # Soft sample + max id.
    y, y_id = gumbel_connector(logits, temperature, noise_key,
                               hard=False, return_max_id=True)
    jax.block_until_ready((y, y_id))

    # Hard (one-hot) sample with the same noise.
    y_onehot = gumbel_connector(logits, temperature, noise_key,
                                hard=True, return_max_id=False)
    jax.block_until_ready(y_onehot)

    # Sanity checks: soft rows sum to 1, hard rows are one-hot, and both paths
    # agree on the argmax for identical noise.
    assert y.shape == (batch, n_class)
    assert y_id.shape == (batch, 1)
    assert jnp.allclose(jnp.sum(y, axis=-1), 1.0, atol=1e-5)
    assert jnp.allclose(jnp.sum(y_onehot, axis=-1), 1.0, atol=1e-6)
    assert jnp.all(jnp.argmax(y_onehot, axis=-1) == y_id[:, 0])
    assert jnp.all(jnp.argmax(y, axis=-1) == y_id[:, 0])

    print("KERNEL_OK")
</pallas_src>

<mosaic_0001>
module attributes {stable_mosaic.version = 11 : i64} {
  func.func @_gumbel_softmax_kernel(%arg0: i32, %arg1: memref<1xf32, #tpu.memory_space<smem>>, %arg2: memref<8x128xf32, #tpu.memory_space<vmem>>, %arg3: memref<8x128xf32, #tpu.memory_space<vmem>>, %arg4: memref<8x128xf32, #tpu.memory_space<vmem>>, %arg5: memref<8x1xi32, #tpu.memory_space<vmem>>) attributes {dimension_semantics = [#tpu.dimension_semantics<parallel>], iteration_bounds = array<i64: 1>, scalar_prefetch = 0 : i64, scratch_operands = 0 : i64, tpu.core_type = #tpu.core_type<tc>, window_params = [{transform_indices = @transform_0, window_bounds = array<i64: 1>}, {transform_indices = @transform_1, window_bounds = array<i64: 8, 128>}, {transform_indices = @transform_2, window_bounds = array<i64: 8, 128>}, {transform_indices = @transform_3, window_bounds = array<i64: 8, 128>}, {transform_indices = @transform_4, window_bounds = array<i64: 8, 1>}]} {
    %c0 = arith.constant 0 : index
    %c0_0 = arith.constant 0 : index
    %0 = vector.load %arg3[%c0, %c0_0] : memref<8x128xf32, #tpu.memory_space<vmem>>, vector<8x128xf32>
    %cst = arith.constant 9.99999968E-21 : f32
    %1 = vector.broadcast %cst : f32 to vector<8x128xf32>
    %2 = arith.addf %0, %1 : vector<8x128xf32>
    %3 = math.log %2 : vector<8x128xf32>
    %cst_1 = arith.constant 0.000000e+00 : f32
    %4 = vector.broadcast %cst_1 : f32 to vector<8x128xf32>
    %5 = arith.subf %4, %3 : vector<8x128xf32>
    %cst_2 = arith.constant 9.99999968E-21 : f32
    %6 = vector.broadcast %cst_2 : f32 to vector<8x128xf32>
    %7 = arith.addf %5, %6 : vector<8x128xf32>
    %8 = math.log %7 : vector<8x128xf32>
    %cst_3 = arith.constant 0.000000e+00 : f32
    %9 = vector.broadcast %cst_3 : f32 to vector<8x128xf32>
    %10 = arith.subf %9, %8 : vector<8x128xf32>
    %c0_4 = arith.constant 0 : index
    %c0_5 = arith.constant 0 : index
    %11 = vector.load %arg2[%c0_4, %c0_5] : memref<8x128xf32, #tpu.memory_space<vmem>>, vector<8x128xf32>
    %12 = arith.addf %11, %10 : vector<8x128xf32>
    %13 = tpu.iota {dimensions = array<i32: 1>} : vector<8x128xi32>
    %cst_6 = arith.constant dense<0xFF800000> : vector<8xf32>
    %14 = vector.multi_reduction <maximumf>, %12, %cst_6 [1] : vector<8x128xf32> to vector<8xf32>
    %15 = vector.shape_cast %14 : vector<8xf32> to vector<8x1xf32>
    %16 = vector.broadcast %15 : vector<8x1xf32> to vector<8x128xf32>
    %17 = arith.cmpf oeq, %12, %16 : vector<8x128xf32>
    %c128_i32 = arith.constant 128 : i32
    %18 = vector.broadcast %c128_i32 : i32 to vector<8x128xi32>
    %19 = arith.select %17, %13, %18 : vector<8x128xi1>, vector<8x128xi32>
    %cst_7 = arith.constant dense<2147483647> : vector<8xi32>
    %20 = vector.multi_reduction <minsi>, %19, %cst_7 [1] : vector<8x128xi32> to vector<8xi32>
    %21 = vector.shape_cast %20 : vector<8xi32> to vector<8x1xi32>
    %c0_8 = arith.constant 0 : index
    %c0_9 = arith.constant 0 : index
    %22 = vector.load %arg5[%c0_8, %c0_9] : memref<8x1xi32, #tpu.memory_space<vmem>>, vector<8x1xi32>
    tpu.vector_store %arg5[%c0_8, %c0_9], %21 {strides = array<i32>} : memref<8x1xi32, #tpu.memory_space<vmem>>, vector<8x1xi32>,
    %c0_10 = arith.constant 0 : index
    %23 = memref.load %arg1[%c0_10] : memref<1xf32, #tpu.memory_space<smem>>
    %cst_11 = arith.constant 1.000000e+00 : f32
    %24 = arith.divf %cst_11, %23 : f32
    %25 = vector.broadcast %15 : vector<8x1xf32> to vector<8x128xf32>
    %26 = arith.subf %12, %25 : vector<8x128xf32>
    %27 = vector.broadcast %24 : f32 to vector<8x128xf32>
    %28 = arith.mulf %26, %27 : vector<8x128xf32>
    %29 = math.exp %28 : vector<8x128xf32>
    %cst_12 = arith.constant dense<0.000000e+00> : vector<8xf32>
    %30 = vector.multi_reduction <add>, %29, %cst_12 [1] : vector<8x128xf32> to vector<8xf32>
    %31 = vector.shape_cast %30 : vector<8xf32> to vector<8x1xf32>
    %cst_13 = arith.constant 1.000000e+00 : f32
    %32 = vector.broadcast %cst_13 : f32 to vector<8x1xf32>
    %33 = arith.divf %32, %31 : vector<8x1xf32>
    %34 = vector.broadcast %33 : vector<8x1xf32> to vector<8x128xf32>
    %35 = arith.mulf %29, %34 : vector<8x128xf32>
    %c0_14 = arith.constant 0 : index
    %c0_15 = arith.constant 0 : index
    %36 = vector.load %arg4[%c0_14, %c0_15] : memref<8x128xf32, #tpu.memory_space<vmem>>, vector<8x128xf32>
    tpu.vector_store %arg4[%c0_14, %c0_15], %35 {strides = array<i32>} : memref<8x128xf32, #tpu.memory_space<vmem>>, vector<8x128xf32>,
    return
  }
  func.func @transform_0(%arg0: i32) -> i32 {
    %c0_i32 = arith.constant 0 : i32
    %c0_i32_0 = arith.constant 0 : i32
    return %c0_i32 : i32
  }
  func.func @transform_1(%arg0: i32) -> (i32, i32) {
    %c0_i32 = arith.constant 0 : i32
    %c0_i32_0 = arith.constant 0 : i32
    return %arg0, %c0_i32 : i32, i32
  }
  func.func @transform_2(%arg0: i32) -> (i32, i32) {
    %c0_i32 = arith.constant 0 : i32
    %c0_i32_0 = arith.constant 0 : i32
    return %arg0, %c0_i32 : i32, i32
  }
  func.func @transform_3(%arg0: i32) -> (i32, i32) {
    %c0_i32 = arith.constant 0 : i32
    %c0_i32_0 = arith.constant 0 : i32
    return %arg0, %c0_i32 : i32, i32
  }
  func.func @transform_4(%arg0: i32) -> (i32, i32) {
    %c0_i32 = arith.constant 0 : i32
    %c0_i32_0 = arith.constant 0 : i32
    return %arg0, %c0_i32 : i32, i32
  }
}

</mosaic_0001>

<bundles_post_ra>
// kernel: tpu_custom_call.1
= control target key start
LH: loop header
LB: loop body
LE: loop exit
PB: predicated region body
PF: predicated region fallthrough
CT: control target
= control target key end

     0   :  { %11 = vsyncpa [#allocation4], 0  ;;  %s234_s0 = inlined_call_operand.<no memory space> [shape: f32[1], index: 0, kind: input, shape index: {}]   ;;  %s235_s1 = inlined_call_operand.hbm [shape: f32[8,128], index: 1, kind: input, shape index: {}]   ;;  %s236_s2 = inlined_call_operand.hbm [shape: f32[8,128], index: 2, kind: input, shape index: {}]   ;;  %s237_s3 = inlined_call_operand.hbm [shape: f32[8,128], index: 3, kind: output, shape index: {0}]   ;;  %s238_s4 = inlined_call_operand.vmem [shape: s32[8,1], index: 4, kind: output, shape index: {1}]  }
   0x1   :  { %12 = vsyncpa [#allocation7], 0 }
   0x2   :  { %13 = vsyncpa [#allocation5], 0  ;;  %s191_s15 = smov [#allocation3]   ;;  %s192_s17 = smov [#allocation6]  }
   0x3   :  { %s22_s16 = sshll.u32 %s191_s15, 4  ;;  %s32_s18 = sshll.u32 %s192_s17, 4  ;;  %s23_s16 = int_to_ptr.vmem [resolvable:$true] %s22_s16  ;;  %s33_s18 = int_to_ptr.vmem [resolvable:$true] %s32_s18 }
   0x4   :  { %s133_s19 = scalar_lea.vmem %s23_s16, 128  ;;  %p138_p1 = scmp.lt.s32.totalorder %s23_s16, %s23_s16 }
   0x5   :  { %p134_p0 = scmp.ne.s32.totalorder %s23_s16, %s133_s19  ;;  %p139_p2 = scmp.lt.s32.totalorder %s133_s19, %s133_s19 }
   0x7   :  { %p140_p3 = por %p139_p2, %p138_p1 }
   0x9   :  { %p141_p4 = pnand %p140_p3, %p134_p0 }
   0xb   :  { %144 = shalt.err (!%p141_p4)
}
   0xc   :  { %25 = dma.hbm_to_vmem [thread:$0]  %s235_s1, 128, %s23_s16, [#allocation4]  }
   0xd   :  { %s153_s22 = scalar_lea.vmem %s33_s18, 128  ;;  %p158_p6 = scmp.lt.s32.totalorder %s33_s18, %s33_s18 }
   0xe   :  { %p154_p5 = scmp.ne.s32.totalorder %s33_s18, %s153_s22  ;;  %p159_p7 = scmp.lt.s32.totalorder %s153_s22, %s153_s22 }
  0x10   :  { %p160_p8 = por %p159_p7, %p158_p6 }
  0x12   :  { %p161_p9 = pnand %p160_p8, %p154_p5 }
  0x14   :  { %164 = shalt.err (!%p161_p9)
}
  0x15   :  { %35 = dma.hbm_to_vmem [thread:$0]  %s236_s2, 128, %s33_s18, [#allocation7]  }
  0x16   :  { %185 = dma.done.wait [#allocation4], 128  }
  0x17   :  { %186 = vsyncadd [#allocation4], 4294967168 }
  0x18   :  { %187 = dma.done.wait [#allocation7], 128  }
  0x19   :  { %188 = vsyncadd [#allocation7], 4294967168  ;;  %v76_v0 = vstv %s234_s0  ;;  %v42_v1 = vld [vmem:[#allocation6] sm:$0xff]  ;;  %v51_v10 = vld [vmem:[#allocation3] sm:$0xff]  ;;  %v53_v13 = vlaneseq  ;;  %s193_s0 = smov [#allocation8]  }
  0x1a   :  { %115 = vrcp.f32 %v76_v0  ;;  %v43_v2 = vadd.f32 1e-20, %v42_v1  ;;  %s96_s2 = sshll.u32 %s193_s0, 4  ;;  %s97_s2 = int_to_ptr.vmem [resolvable:$true] %s96_s2 }
  0x1b   :  { %v54_v14 = vand.u32 127, %v53_v13  ;;  %s165_s27 = scalar_lea.vmem %s97_s2, 128  ;;  %p170_p11 = scmp.lt.s32.totalorder %s97_s2, %s97_s2 }
  0x1c   :  { %117 = vlog2.f32 %v43_v2  ;;  %p166_p10 = scmp.ne.s32.totalorder %s97_s2, %s165_s27  ;;  %p171_p12 = scmp.lt.s32.totalorder %s165_s27, %s165_s27 }
  0x1e   :  { %p172_p13 = por %p171_p12, %p170_p11 }
  0x20   :  { %p173_p0 = pnand %p172_p13, %p166_p10 }
  0x27   :  { %v116_v3 = vpop.eup %115 }
  0x28   :  { %110 = vpush %v116_v3 }
  0x29   :  { %v118_v4 = vpop.eup %117 }
  0x2a   :  { %v45_v5 = vmul.f32 0.6931472, %v118_v4 }
  0x2c   :  { %v46_v6 = vsub.f32 0.0, %v45_v5 }
  0x2e   :  { %v47_v7 = vadd.f32 1e-20, %v46_v6 }
  0x30   :  { %119 = vlog2.f32 %v47_v7 }
  0x3d   :  { %v120_v8 = vpop.eup %119 }
  0x3e   :  { %v49_v9 = vmul.f32 0.6931472, %v120_v8 }
  0x40   :  { %v50_v11 = vsub.f32 0.0, %v49_v9 }
  0x42   :  { %v52_v12 = vadd.f32 %v51_v10, %v50_v11 }
  0x44   :  { %55 = vmax.xlane.f32.xlu0 %v52_v12 }
  0x59   :  { %s111_s1 = spop %110 }
  0x5a   :  { %v80_v16 = vstv %s111_s1 }
  0xcd   :  { %v56_v15 = vpop.xlane.xlu0 %55 }
  0xce   :  { %vm57_vm0 = vcmp.eq.f32.partialorder %v52_v12, %v56_v15  ;;  %v79_v17 = vsub.f32 %v52_v12, %v56_v15 }
  0xcf   :  { %v58_v18 = vsel %vm57_vm0, %v54_v14, 128 }
  0xd0   :  { %v81_v19 = vmul.f32 %v80_v16, %v79_v17  ;;  %v60_v20 = vshra.s32 %v58_v18, 16  ;;  %v59_v24 = vand.u32 65535, %v58_v18 }
  0xd2   :  { %v82_v21 = vmul.f32 1.442695, %v81_v19  ;;  %v62_v22 = vcvt.s32.f32 %v60_v20  ;;  %v61_v26 = vcvt.s32.f32 %v59_v24 }
  0xd4   :  { %121 = vpow2.f32 %v82_v21  ;;  %63 = vmin.xlane.f32.xlu0 %v62_v22 }
  0xe1   :  { %v122_v23 = vpop.eup %121 }
  0xe2   :  { %84 = vadd.xlane.f32.xlu1 %v122_v23 }
 0x15d   :  { %v64_v25 = vpop.xlane.xlu0 %63 }
 0x15e   :  { %vm65_vm1 = vcmp.eq.f32.partialorder %v62_v22, %v64_v25 }
 0x15f   :  { %v66_v27 = vsel %vm65_vm1, %v61_v26, inf }
 0x160   :  { %67 = vmin.xlane.f32.xlu1 %v66_v27 }
 0x16b   :  { %v85_v28 = vpop.xlane.xlu1 %84 }
 0x16c   :  { %123 = vrcp.f32 %v85_v28 }
 0x179   :  { %v124_v29 = vpop.eup %123 }
 0x17a   :  { %v88_v30 = vmul.f32 %v124_v29, %v122_v23 }
 0x17c   :  { %89 = vst [vmem:[#allocation8] sm:$0xff] %v88_v30 }
 0x17d   :  { %176 = shalt.err (!%p173_p0)
}
 0x17e   :  { %99 = dma.vmem_to_hbm [thread:$0]  %s97_s2, 128, %s237_s3, [#allocation5]   ;;  %v70_v31 = vcvt.f32.s32 %v64_v25  ;;  %vm73_vm2 = vcmask 7168  }
 0x180   :  { %v71_v33 = vshll.u32 %v70_v31, 16 }
 0x1e9   :  { %v68_v32 = vpop.xlane.xlu1 %67 }
 0x1ea   :  { %v69_v34 = vcvt.f32.s32 %v68_v32 }
 0x1ec   :  { %v72_v35 = vadd.s32 %v71_v33, %v69_v34 }
 0x1ee   :  { %74 = vst.msk [vmem:[%s238_s4] sm:$0xff] %vm73_vm2, %v72_v35 }
 0x1ef   :  { %189 = dma.done.wait [#allocation5], 128  }
 0x1f0   :  { %190 = vsyncadd [#allocation5], 4294967168 }
 0x1f1   :  { %107 = vsyncpa [#allocation4], 1 }
 0x1f2   :  { %108 = vsyncpa [#allocation7], 1 }
 0x1f3   :  { %109 = vsyncpa [#allocation5], 1 }

</bundles_post_ra>
